<compile_context>
chip_gen: v5e
topology: v5e:2x2
jax: 0.10.0
libtpu: 0.0.40
codegen_flags: <defaults>
</compile_context>

<pallas_src>
import jax
import jax.numpy as jnp
from jax.experimental import pallas as pl
from jax.experimental.pallas import tpu as pltpu

KERNEL_SIZE = 4  # Conv1d kernel size in the PyTorch module


# --------------------------------------------------------------------------
# Pallas kernel: whole critic forward for one batch tile (weights resident).
# --------------------------------------------------------------------------
def critic_kernel(x_ref, w1_ref, b1_ref, w2_ref, misc_ref, out_ref):
    # First fused layer: scalar FCs + 3 convs as one Toeplitz matmul (bf16 in).
    fcin = jnp.dot(x_ref[...], w1_ref[...], preferred_element_type=jnp.float32)
    # Fused bias+ReLU+downcast: materialize the [tB, F] intermediate in bf16.
    fcin = jnp.maximum(fcin + b1_ref[...], 0.0).astype(jnp.bfloat16)

    # fullyConnected
    h = jnp.dot(fcin, w2_ref[...], preferred_element_type=jnp.float32)
    misc = misc_ref[...]                                    # [3, H] f32
    h = jnp.maximum(h + misc[0:1, :], 0.0)                  # [tB, H]

    # outputLayer (N=1): VPU multiply + lane reduce instead of an [H,1] matmul.
    val = jnp.sum(h * misc[1:2, :], axis=-1, keepdims=True) + misc[2:3, 0:1]
    # Lane-dense store: (tB, 1) -> (1, tB) so the output block fills lanes.
    out_ref[...] = val.reshape(out_ref.shape)


# --------------------------------------------------------------------------
# Parameter init (deterministic, shapes per the PyTorch __init__)
# --------------------------------------------------------------------------
def _xavier_uniform(key, shape, fan_in, fan_out):
    bound = (6.0 / (fan_in + fan_out)) ** 0.5
    return jax.random.uniform(key, shape, jnp.float32, -bound, bound)


def _xavier_normal(key, shape, fan_in, fan_out):
    std = (2.0 / (fan_in + fan_out)) ** 0.5
    return jax.random.normal(key, shape, jnp.float32) * std


def init_params(key, state_dim, a_dim, n_conv=128, n_fc=128, n_fc1=128):
    s1 = state_dim[1]
    lout = s1 - KERNEL_SIZE + 1
    aout = a_dim - KERNEL_SIZE + 1
    num_fc_input = 2 * n_conv * lout + 3 * n_fc + n_conv * aout

    keys = jax.random.split(key, 8)
    params = {
        # Linear(1, n_fc): weight [n_fc, 1], bias [n_fc]
        "W_br": _xavier_uniform(keys[0], (n_fc, 1), 1, n_fc),
        "b_br": jnp.zeros((n_fc,), jnp.float32),
        "W_buf": _xavier_uniform(keys[1], (n_fc, 1), 1, n_fc),
        "b_buf": jnp.zeros((n_fc,), jnp.float32),
        "W_left": _xavier_uniform(keys[2], (n_fc, 1), 1, n_fc),
        "b_left": jnp.zeros((n_fc,), jnp.float32),
        # Conv1d(1, n_conv, 4): weight [n_conv, 1, 4], bias [n_conv]
        "W_t": _xavier_uniform(keys[3], (n_conv, 1, KERNEL_SIZE),
                               KERNEL_SIZE, n_conv * KERNEL_SIZE),
        "b_t": jnp.zeros((n_conv,), jnp.float32),
        "W_d": _xavier_uniform(keys[4], (n_conv, 1, KERNEL_SIZE),
                               KERNEL_SIZE, n_conv * KERNEL_SIZE),
        "b_d": jnp.zeros((n_conv,), jnp.float32),
        "W_c": _xavier_normal(keys[5], (n_conv, 1, KERNEL_SIZE),
                              KERNEL_SIZE, n_conv * KERNEL_SIZE),
        "b_c": jnp.zeros((n_conv,), jnp.float32),
        # Linear(num_fc_input, n_fc1)
        "W_fc": _xavier_uniform(keys[6], (n_fc1, num_fc_input), num_fc_input, n_fc1),
        "b_fc": jnp.zeros((n_fc1,), jnp.float32),
        # Linear(n_fc1, 1)
        "W_out": _xavier_uniform(keys[7], (1, n_fc1), n_fc1, 1),
        "b_out": jnp.zeros((1,), jnp.float32),
    }
    return params


# --------------------------------------------------------------------------
# One-time weight packing: PyTorch layout -> fused kernel layout
# --------------------------------------------------------------------------
def _conv_toeplitz(Wc, lin):
    """Conv1d(1->C, K) weight [C,1,K] -> Toeplitz [lin, C*Lout] with
    PyTorch channel-major flatten order (column index = c*Lout + l)."""
    C, _, K = Wc.shape
    lout = lin - K + 1
    T = jnp.zeros((lin, C, lout), jnp.float32)
    for l in range(lout):                      # tiny static loop, runs once
        T = T.at[l:l + K, :, l].set(Wc[:, 0, :].T)      # [K, C]
    return T.reshape(lin, C * lout)


def pack_params(params, s1, a_dim):
    """Fold the whole first layer into W1/b1 and pack the rest into 3 arrays."""
    n_conv = params["W_t"].shape[0]
    n_fc = params["W_br"].shape[0]
    n_fc1 = params["W_fc"].shape[0]
    lout = s1 - KERNEL_SIZE + 1
    aout = a_dim - KERNEL_SIZE + 1
    F = 3 * n_fc + n_conv * (2 * lout + aout)
    din = 6 * s1

    W1 = jnp.zeros((din, F), jnp.float32)
    col = 0
    # bitrateFc: channel 0, last timestep
    W1 = W1.at[0 * s1 + s1 - 1, col:col + n_fc].set(params["W_br"][:, 0]); col += n_fc
    # bufferFc: channel 1, last timestep
    W1 = W1.at[1 * s1 + s1 - 1, col:col + n_fc].set(params["W_buf"][:, 0]); col += n_fc
    # tConv1d on channel 2 (full length), dConv1d on channel 3 (full length)
    W1 = W1.at[2 * s1:3 * s1, col:col + n_conv * lout].set(
        _conv_toeplitz(params["W_t"], s1)); col += n_conv * lout
    W1 = W1.at[3 * s1:4 * s1, col:col + n_conv * lout].set(
        _conv_toeplitz(params["W_d"], s1)); col += n_conv * lout
    # cConv1d on channel 4, first a_dim entries only
    W1 = W1.at[4 * s1:4 * s1 + a_dim, col:col + n_conv * aout].set(
        _conv_toeplitz(params["W_c"], a_dim)); col += n_conv * aout
    # leftChunkFc: channel 5, last timestep
    W1 = W1.at[5 * s1 + s1 - 1, col:col + n_fc].set(params["W_left"][:, 0]); col += n_fc
    assert col == F

    b1 = jnp.concatenate([
        params["b_br"], params["b_buf"],
        jnp.repeat(params["b_t"], lout), jnp.repeat(params["b_d"], lout),
        jnp.repeat(params["b_c"], aout), params["b_left"],
    ]).reshape(1, F)

    W2 = params["W_fc"].T                                   # [F, H]
    misc = jnp.zeros((3, n_fc1), jnp.float32)
    misc = misc.at[0].set(params["b_fc"])                   # row 0: b_fc
    misc = misc.at[1].set(params["W_out"][0, :])            # row 1: W_out
    misc = misc.at[2, 0].set(params["b_out"][0])            # row 2, lane 0: b_out

    return {
        "W1": W1.astype(jnp.bfloat16),
        "b1": b1,
        "W2": W2.astype(jnp.bfloat16),
        "misc": misc,
    }


# --------------------------------------------------------------------------
# Batch-tiling plan: pad to multiple of 8, >=2 grid steps when possible
# (engages both v7x TensorCores), cap tile at 1024 rows.
# --------------------------------------------------------------------------
def _plan_batch(B):
    B8 = max(8, -(-B // 8) * 8)                 # round up to multiple of 8
    if B8 <= 8:
        tB = B8                                 # single tiny tile
    else:
        half = -(-B8 // 2)                      # target 2 steps for v7x megacore
        tB = min(1024, -(-half // 8) * 8)
    num_tiles = -(-B8 // tB)
    return tB, num_tiles, num_tiles * tB


# --------------------------------------------------------------------------
# Wrapper: flatten input (bf16), batch grid with VMEM-resident weights,
# lane-dense output block.
# --------------------------------------------------------------------------
@jax.jit
def critic_forward(packed, inputs):
    B = inputs.shape[0]
    W1, b1, W2, misc = packed["W1"], packed["b1"], packed["W2"], packed["misc"]
    din, F = W1.shape
    H = W2.shape[1]

    # bf16 activations in the wrapper: halves the per-tile x DMA.
    x = inputs.reshape(B, -1).astype(jnp.bfloat16)           # [B, 6*S1]
    assert x.shape[1] == din

    tB, num_tiles, B_pad = _plan_batch(B)
    if B_pad != B:
        x = jnp.pad(x, ((0, B_pad - B), (0, 0)))             # padded rows discarded

    out = pl.pallas_call(
        critic_kernel,
        out_shape=jax.ShapeDtypeStruct((num_tiles, tB), jnp.float32),
        grid=(num_tiles,),
        in_specs=[
            pl.BlockSpec((tB, din), lambda i: (i, 0)),        # batch tile streamed
            pl.BlockSpec((din, F), lambda i: (0, 0)),         # weights stay resident
            pl.BlockSpec((1, F), lambda i: (0, 0)),
            pl.BlockSpec((F, H), lambda i: (0, 0)),
            pl.BlockSpec((3, H), lambda i: (0, 0)),
        ],
        out_specs=pl.BlockSpec((1, tB), lambda i: (i, 0)),    # lane-dense output
        compiler_params=pltpu.CompilerParams(
            dimension_semantics=("parallel",)),               # v7x: shard across TCs
    )(x, W1, b1, W2, misc)

    # (num_tiles, tB) -> (B, 1); drop padded rows.
    return out.reshape(B_pad, 1)[:B]


# --------------------------------------------------------------------------
# Pure-JAX reference (mirrors the PyTorch forward literally, f32)
# --------------------------------------------------------------------------
def reference_forward(params, inputs, a_dim):
    B = inputs.shape[0]

    def lin(x, W, b):
        return x @ W.T + b

    def conv1d(x, W, b):  # x [B, L], W [C,1,K], b [C] -> [B, C, Lout]
        K = W.shape[2]
        lout = x.shape[1] - K + 1
        wins = jnp.stack([x[:, l:l + K] for l in range(lout)], axis=1)  # [B, Lout, K]
        y = jnp.einsum("blk,ck->bcl", wins, W[:, 0, :]) + b[None, :, None]
        return jax.nn.relu(y)

    br = jax.nn.relu(lin(inputs[:, 0:1, -1], params["W_br"], params["b_br"]))
    buf = jax.nn.relu(lin(inputs[:, 1:2, -1], params["W_buf"], params["b_buf"]))
    t = conv1d(inputs[:, 2, :], params["W_t"], params["b_t"])
    d = conv1d(inputs[:, 3, :], params["W_d"], params["b_d"])
    c = conv1d(inputs[:, 4, :a_dim], params["W_c"], params["b_c"])
    left = jax.nn.relu(lin(inputs[:, 5:6, -1], params["W_left"], params["b_left"]))

    fcin = jnp.concatenate(
        [br, buf, t.reshape(B, -1), d.reshape(B, -1), c.reshape(B, -1), left], axis=1
    )
    h = jax.nn.relu(fcin @ params["W_fc"].T + params["b_fc"])
    return h @ params["W_out"].T + params["b_out"]


# --------------------------------------------------------------------------
if __name__ == "__main__":
    state_dim = (6, 8)   # (channels, history length) — canonical Pensieve state
    a_dim = 6            # number of bitrate levels
    B = 2

    key = jax.random.PRNGKey(0)
    pkey, xkey = jax.random.split(key)
    params = init_params(pkey, state_dim, a_dim, n_conv=128, n_fc=128, n_fc1=128)
    inputs = jax.random.normal(xkey, (B, state_dim[0], state_dim[1]), jnp.float32)

    packed = pack_params(params, state_dim[1], a_dim)   # one-time weight packing

    out = critic_forward(packed, inputs)
    out = jax.block_until_ready(out)

    ref = reference_forward(params, inputs, a_dim)
    assert out.shape == (B, 1)
    # Tolerance relaxed vs. f32 reference because x/W1/W2/fcin are bf16 in the kernel.
    assert jnp.allclose(out, ref, rtol=2e-2, atol=2e-2), (out, ref)

    print("KERNEL_OK")
</pallas_src>

<mosaic_0001>
module attributes {stable_mosaic.version = 11 : i64} {
  func.func @critic_kernel(%arg0: i32, %arg1: memref<8x48xbf16, #tpu.memory_space<vmem>>, %arg2: memref<48x2048xbf16, #tpu.memory_space<vmem>>, %arg3: memref<1x2048xf32, #tpu.memory_space<vmem>>, %arg4: memref<2048x128xbf16, #tpu.memory_space<vmem>>, %arg5: memref<3x128xf32, #tpu.memory_space<vmem>>, %arg6: memref<1x8xf32, #tpu.memory_space<vmem>>) attributes {dimension_semantics = [#tpu.dimension_semantics<parallel>], iteration_bounds = array<i64: 1>, scalar_prefetch = 0 : i64, scratch_operands = 0 : i64, tpu.core_type = #tpu.core_type<tc>, window_params = [{transform_indices = @transform_0, window_bounds = array<i64: 8, 48>}, {pipeline_mode = #tpu.pipeline_mode<synchronous>, transform_indices = @transform_1, window_bounds = array<i64: 48, 2048>}, {pipeline_mode = #tpu.pipeline_mode<synchronous>, transform_indices = @transform_2, window_bounds = array<i64: 1, 2048>}, {pipeline_mode = #tpu.pipeline_mode<synchronous>, transform_indices = @transform_3, window_bounds = array<i64: 2048, 128>}, {pipeline_mode = #tpu.pipeline_mode<synchronous>, transform_indices = @transform_4, window_bounds = array<i64: 3, 128>}, {transform_indices = @transform_5, window_bounds = array<i64: 1, 8>}]} {
    %c0 = arith.constant 0 : index
    %c0_0 = arith.constant 0 : index
    %0 = vector.load %arg1[%c0, %c0_0] : memref<8x48xbf16, #tpu.memory_space<vmem>>, vector<8x48xbf16>
    %c0_1 = arith.constant 0 : index
    %c0_2 = arith.constant 0 : index
    %1 = vector.load %arg2[%c0_1, %c0_2] : memref<48x2048xbf16, #tpu.memory_space<vmem>>, vector<48x2048xbf16>
    %cst = arith.constant dense<0.000000e+00> : vector<8x2048xf32>
    %2 = tpu.matmul %0, %1, %cst {dimension_numbers = #tpu.dot_dimension_numbers<[1], [0], [0], [1], [0, 0, 1, 1], [], []>} : vector<8x48xbf16>, vector<48x2048xbf16>, vector<8x2048xf32> -> vector<8x2048xf32>
    %c0_3 = arith.constant 0 : index
    %c0_4 = arith.constant 0 : index
    %3 = vector.load %arg3[%c0_3, %c0_4] : memref<1x2048xf32, #tpu.memory_space<vmem>>, vector<1x2048xf32>
    %4 = vector.broadcast %3 : vector<1x2048xf32> to vector<8x2048xf32>
    %5 = arith.addf %2, %4 : vector<8x2048xf32>
    %cst_5 = arith.constant 0.000000e+00 : f32
    %6 = vector.broadcast %cst_5 : f32 to vector<8x2048xf32>
    %7 = arith.maximumf %5, %6 : vector<8x2048xf32>
    %8 = arith.truncf %7 : vector<8x2048xf32> to vector<8x2048xbf16>
    %c0_6 = arith.constant 0 : index
    %c0_7 = arith.constant 0 : index
    %9 = vector.load %arg4[%c0_6, %c0_7] : memref<2048x128xbf16, #tpu.memory_space<vmem>>, vector<2048x128xbf16>
    %cst_8 = arith.constant dense<0.000000e+00> : vector<8x128xf32>
    %10 = tpu.matmul %8, %9, %cst_8 {dimension_numbers = #tpu.dot_dimension_numbers<[1], [0], [0], [1], [0, 0, 1, 1], [], []>} : vector<8x2048xbf16>, vector<2048x128xbf16>, vector<8x128xf32> -> vector<8x128xf32>
    %c0_9 = arith.constant 0 : index
    %c0_10 = arith.constant 0 : index
    %11 = vector.load %arg5[%c0_9, %c0_10] : memref<3x128xf32, #tpu.memory_space<vmem>>, vector<3x128xf32>
    %12 = vector.extract_strided_slice %11 {offsets = [0, 0], sizes = [1, 128], strides = [1, 1]} : vector<3x128xf32> to vector<1x128xf32>
    %13 = vector.broadcast %12 : vector<1x128xf32> to vector<8x128xf32>
    %14 = arith.addf %10, %13 : vector<8x128xf32>
    %cst_11 = arith.constant 0.000000e+00 : f32
    %15 = vector.broadcast %cst_11 : f32 to vector<8x128xf32>
    %16 = arith.maximumf %14, %15 : vector<8x128xf32>
    %17 = vector.extract_strided_slice %11 {offsets = [1, 0], sizes = [1, 128], strides = [1, 1]} : vector<3x128xf32> to vector<1x128xf32>
    %18 = vector.broadcast %17 : vector<1x128xf32> to vector<8x128xf32>
    %19 = arith.mulf %16, %18 : vector<8x128xf32>
    %cst_12 = arith.constant dense<0.000000e+00> : vector<8xf32>
    %20 = vector.multi_reduction <add>, %19, %cst_12 [1] : vector<8x128xf32> to vector<8xf32>
    %21 = vector.shape_cast %20 : vector<8xf32> to vector<8x1xf32>
    %22 = vector.extract_strided_slice %11 {offsets = [2, 0], sizes = [1, 1], strides = [1, 1]} : vector<3x128xf32> to vector<1x1xf32>
    %23 = vector.broadcast %22 : vector<1x1xf32> to vector<8x1xf32>
    %24 = arith.addf %21, %23 : vector<8x1xf32>
    %25 = vector.shape_cast %24 : vector<8x1xf32> to vector<1x8xf32>
    %c0_13 = arith.constant 0 : index
    %c0_14 = arith.constant 0 : index
    %26 = vector.load %arg6[%c0_13, %c0_14] : memref<1x8xf32, #tpu.memory_space<vmem>>, vector<1x8xf32>
    tpu.vector_store %arg6[%c0_13, %c0_14], %25 {strides = array<i32>} : memref<1x8xf32, #tpu.memory_space<vmem>>, vector<1x8xf32>,
    return
  }
  func.func @transform_0(%arg0: i32) -> (i32, i32) {
    %c0_i32 = arith.constant 0 : i32
    %c0_i32_0 = arith.constant 0 : i32
    return %arg0, %c0_i32 : i32, i32
  }
  func.func @transform_1(%arg0: i32) -> (i32, i32) {
    %c0_i32 = arith.constant 0 : i32
    %c0_i32_0 = arith.constant 0 : i32
    %c0_i32_1 = arith.constant 0 : i32
    return %c0_i32, %c0_i32_0 : i32, i32
  }
  func.func @transform_2(%arg0: i32) -> (i32, i32) {
    %c0_i32 = arith.constant 0 : i32
    %c0_i32_0 = arith.constant 0 : i32
    %c0_i32_1 = arith.constant 0 : i32
    return %c0_i32, %c0_i32_0 : i32, i32
  }
  func.func @transform_3(%arg0: i32) -> (i32, i32) {
    %c0_i32 = arith.constant 0 : i32
    %c0_i32_0 = arith.constant 0 : i32
    %c0_i32_1 = arith.constant 0 : i32
    return %c0_i32, %c0_i32_0 : i32, i32
  }
  func.func @transform_4(%arg0: i32) -> (i32, i32) {
    %c0_i32 = arith.constant 0 : i32
    %c0_i32_0 = arith.constant 0 : i32
    %c0_i32_1 = arith.constant 0 : i32
    return %c0_i32, %c0_i32_0 : i32, i32
  }
  func.func @transform_5(%arg0: i32) -> (i32, i32) {
    %c0_i32 = arith.constant 0 : i32
    %c0_i32_0 = arith.constant 0 : i32
    return %arg0, %c0_i32 : i32, i32
  }
}

</mosaic_0001>

<bundles_post_ra>
// kernel: critic_forward.1
= control target key start
LH: loop header
LB: loop body
LE: loop exit
PB: predicated region body
PF: predicated region fallthrough
CT: control target
= control target key end

     0   :  { %10 = vsyncpa [#allocation3], 0  ;;  %s2945_s0 = inlined_call_operand.vmem [shape: bf16[8,48], index: 0, kind: input, shape index: {}]   ;;  %s2946_s1 = inlined_call_operand.hbm [shape: bf16[48,2048], index: 1, kind: input, shape index: {}]   ;;  %s2947_s2 = inlined_call_operand.vmem [shape: f32[1,2048], index: 2, kind: input, shape index: {}]   ;;  %s2948_s3 = inlined_call_operand.hbm [shape: bf16[2048,128], index: 3, kind: input, shape index: {}]   ;;  %s2949_s4 = inlined_call_operand.vmem [shape: f32[3,128], index: 4, kind: input, shape index: {}]   ;;  %s2950_s5 = inlined_call_operand.vmem [shape: f32[1,8], index: 5, kind: output, shape index: {}]  }
   0x1   :  { %s18_s20 = sshll.u32 %s2946_s1, 4  ;;  %s19_s20 = int_to_ptr.hbm [resolvable:$true] %s18_s20 }
   0x2   :  { %11 = vsyncpa [#allocation5], 0  ;;  %s2834_s21 = smov [#allocation2]   ;;  %s33_s25 = sshll.u32 %s2948_s3, 4  ;;  %s34_s25 = int_to_ptr.hbm [resolvable:$true] %s33_s25 }
   0x3   :  { %s20_s22 = sshll.u32 %s2834_s21, 4  ;;  %s2835_s26 = smov 1024   ;;  %s21_s22 = int_to_ptr.vmem [resolvable:$true] %s20_s22 }
   0x4   :  { %s2836_s27 = smov 64   ;;  %s2837_s28 = smov [#allocation4]  }
   0x5   :  { %26 = dma.hbm_to_vmem [thread:$0]  %s19_s20, 6144, %s21_s22, [#allocation3], %s2835_s26, %s2835_s26, %s2836_s27  }
   0x6   :  { %s35_s29 = sshll.u32 %s2837_s28, 4  ;;  %s2838_s30 = smov 4   ;;  %s36_s29 = int_to_ptr.vmem [resolvable:$true] %s35_s29 }
   0x7   :  { %41 = dma.hbm_to_vmem [thread:$0]  %s34_s25, 16384, %s36_s29, [#allocation5], %s2836_s27, %s2836_s27, %s2838_s30  }
   0x8   :  { %2830 = dma.done.wait [#allocation3], 6144  }
   0x9   :  { %2831 = vsyncadd [#allocation3], 4294961152 }
   0xa   :  { %2832 = dma.done.wait [#allocation5], 16384  }
   0xb   :  { %2833 = vsyncadd [#allocation5], 4294950912  ;;  %v2009_v0 = vld [vmem:[#allocation2 + $0x100] sm:$0xf]  ;;  %v2017_v2 = vld [vmem:[#allocation2 + $0x108] sm:$0xf] }
   0xc   :  { %v2639_v1 = vld [vmem:[#allocation2 + $0x13c] sm:$0xf0]  ;;  %v2640_v4 = vld [vmem:[#allocation2 + $0x144] sm:$0xf0]  ;;  %v2632_v5 = vld [vmem:[#allocation2 + $0x10c] sm:$0xf] }
   0xd   :  { %v2010_v3 = vor.u32 %v2639_v1, %v2009_v0  ;;  %v2019_v6 = vld [vmem:[#allocation2 + $0x148] sm:$0xf0]  ;;  %v2018_v7 = vor.u32 %v2640_v4, %v2017_v2  ;;  %v2631_v9 = vld [vmem:[#allocation2 + $0x104] sm:$0xf]  ;;  %v1945_v11 = vld [vmem:[#allocation2 + $0x80] sm:$0xf] }
   0xe   :  { %v2022_v8 = vor.u32 %v2632_v5, %v2019_v6  ;;  %v2011_v10 = vld [vmem:[#allocation2 + $0x140] sm:$0xf0]  ;;  %v2623_v13 = vld [vmem:[#allocation2 + $0xbc] sm:$0xf0]  ;;  %v1953_v14 = vld [vmem:[#allocation2 + $0x88] sm:$0xf] }
   0xf   :  { %387 = vmatpush.bf16.msra.mxu0 %v2010_v3  ;;  %v2014_v12 = vor.u32 %v2631_v9, %v2011_v10  ;;  %v2624_v15 = vld [vmem:[#allocation2 + $0xc4] sm:$0xf0]  ;;  %413 = vmatpush.bf16.msra.mxu2 %v2018_v7  ;;  %v1946_v16 = vor.u32 %v2623_v13, %v1945_v11  ;;  %v2616_v18 = vld [vmem:[#allocation2 + $0x8c] sm:$0xf]  ;;  %v2615_v20 = vld [vmem:[#allocation2 + $0x84] sm:$0xf] }
  0x10   :  { %426 = vmatpush.bf16.msra.mxu3 %v2022_v8  ;;  %v1954_v17 = vor.u32 %v2624_v15, %v1953_v14  ;;  %v1955_v19 = vld [vmem:[#allocation2 + $0xc8] sm:$0xf0]  ;;  %v1947_v22 = vld [vmem:[#allocation2 + $0xc0] sm:$0xf0]  ;;  %v1881_v23 = vld [vmem:[#allocation2] sm:$0xf] }
  0x11   :  { %400 = vmatpush.bf16.msra.mxu1 %v2014_v12  ;;  %v1958_v21 = vor.u32 %v2616_v18, %v1955_v19  ;;  %v2607_v24 = vld [vmem:[#allocation2 + $0x3c] sm:$0xf0]  ;;  %v1950_v25 = vor.u32 %v2615_v20, %v1947_v22  ;;  %v1889_v26 = vld [vmem:[#allocation2 + $0x8] sm:$0xf]  ;;  %v2600_v28 = vld [vmem:[#allocation2 + $0xc] sm:$0xf] }
  0x12   :  { %v2608_v27 = vld [vmem:[#allocation2 + $0x44] sm:$0xf0]  ;;  %v1882_v29 = vor.u32 %v2607_v24, %v1881_v23  ;;  %v1891_v30 = vld [vmem:[#allocation2 + $0x48] sm:$0xf0]  ;;  %v2599_v31 = vld [vmem:[#allocation2 + $0x4] sm:$0xf] }
  0x13   :  { %388 = vmatpush.bf16.msra.mxu0 %v1946_v16  ;;  %v1883_v32 = vld [vmem:[#allocation2 + $0x40] sm:$0xf0]  ;;  %414 = vmatpush.bf16.msra.mxu2 %v1954_v17  ;;  %v1890_v33 = vor.u32 %v2608_v27, %v1889_v26  ;;  %v1894_v34 = vor.u32 %v2600_v28, %v1891_v30  ;;  %vm378_vm0 = vcmask 392192   ;;  %v2025_v35 = vld [vmem:[#allocation2 + $0x110] sm:$0xf]  ;;  %vm1871_vm1 = vcmask 57344  }
  0x14   :  { %427 = vmatpush.bf16.msra.mxu3 %v1958_v21  ;;  %v2641_v36 = vld [vmem:[#allocation2 + $0x14c] sm:$0xf0]  ;;  %v1886_v37 = vor.u32 %v2599_v31, %v1883_v32  ;;  %v2879_v38 = vld [vmem:[%s2945_s0] sm:$0xf]  ;;  %v2033_v40 = vld [vmem:[#allocation2 + $0x118] sm:$0xf] }
  0x15   :  { %401 = vmatpush.bf16.msra.mxu1 %v1950_v25  ;;  %v2026_v39 = vor.u32 %v2641_v36, %v2025_v35  ;;  %v2642_v41 = vld [vmem:[#allocation2 + $0x154] sm:$0xf0]  ;;  %v2633_v42 = vld [vmem:[#allocation2 + $0x114] sm:$0xf]  ;;  %v2634_v45 = vld [vmem:[#allocation2 + $0x11c] sm:$0xf] }
  0x16   :  { %v2034_v43 = vor.u32 %v2642_v41, %v2033_v40  ;;  %v2027_v44 = vld [vmem:[#allocation2 + $0x150] sm:$0xf0]  ;;  %v2035_v46 = vld [vmem:[#allocation2 + $0x158] sm:$0xf0]  ;;  %v1961_v47 = vld [vmem:[#allocation2 + $0x90] sm:$0xf] }
  0x17   :  { %389 = vmatpush.bf16.msra.mxu0 %v1882_v29  ;;  %v2625_v48 = vld [vmem:[#allocation2 + $0xcc] sm:$0xf0]  ;;  %v1969_v49 = vld [vmem:[#allocation2 + $0x98] sm:$0xf]  ;;  %415 = vmatpush.bf16.msra.mxu2 %v1890_v33  ;;  %v2038_v50 = vor.u32 %v2634_v45, %v2035_v46  ;;  %v2030_v52 = vor.u32 %v2633_v42, %v2027_v44  ;;  %v2617_v54 = vld [vmem:[#allocation2 + $0x94] sm:$0xf] }
  0x18   :  { %428 = vmatpush.bf16.msra.mxu3 %v1894_v34  ;;  %v2626_v51 = vld [vmem:[#allocation2 + $0xd4] sm:$0xf0]  ;;  %v1962_v53 = vor.u32 %v2625_v48, %v1961_v47  ;;  %v2618_v55 = vld [vmem:[#allocation2 + $0x9c] sm:$0xf]  ;;  %v1963_v58 = vld [vmem:[#allocation2 + $0xd0] sm:$0xf0] }
  0x19   :  { %402 = vmatpush.bf16.msra.mxu1 %v1886_v37  ;;  %v1971_v56 = vld [vmem:[#allocation2 + $0xd8] sm:$0xf0]  ;;  %v1970_v57 = vor.u32 %v2626_v51, %v1969_v49  ;;  %v1897_v59 = vld [vmem:[#allocation2 + $0x10] sm:$0xf]  ;;  %v1905_v61 = vld [vmem:[#allocation2 + $0x18] sm:$0xf]  ;;  %v1966_v5 = vor.u32 %v2617_v54, %v1963_v58 }
  0x1a   :  { %2071 = vmatmul.msk.bf16.vlgmr.msra.gmra.mxu0 %vm378_vm0, %v2879_v38  ;;  %v2609_v60 = vld [vmem:[#allocation2 + $0x4c] sm:$0xf0]  ;;  %2073 = vmatmul.msk.bf16.vlgmr.msra.gmra.mxu2 %vm378_vm0, %v2879_v38  ;;  %v2610_v62 = vld [vmem:[#allocation2 + $0x54] sm:$0xf0]  ;;  %v1974_v63 = vor.u32 %v2618_v55, %v1971_v56  ;;  %v2601_v0 = vld [vmem:[#allocation2 + $0x14] sm:$0xf] }
  0x1b   :  { %439 = vmatpush.bf16.msrb.mxu0 %v2026_v39  ;;  %465 = vmatpush.bf16.msrb.mxu2 %v2034_v43  ;;  %v1899_v1 = vld [vmem:[#allocation2 + $0x50] sm:$0xf0]  ;;  %v2602_v2 = vld [vmem:[#allocation2 + $0x1c] sm:$0xf]  ;;  %v2041_v3 = vld [vmem:[#allocation2 + $0x120] sm:$0xf]  ;;  %v1898_v6 = vor.u32 %v2609_v60, %v1897_v59  ;;  %v1906_v10 = vor.u32 %v2610_v62, %v1905_v61 }
  0x1c   :  { %2074 = vmatmul.msk.bf16.vlgmr.msra.gmra.mxu3 %vm378_vm0, %v2879_v38  ;;  %2072 = vmatmul.msk.bf16.vlgmr.msra.gmra.mxu1 %vm378_vm0, %v2879_v38  ;;  %v2643_v4 = vld [vmem:[#allocation2 + $0x15c] sm:$0xf0]  ;;  %v1907_v7 = vld [vmem:[#allocation2 + $0x58] sm:$0xf0]  ;;  %v2049_v8 = vld [vmem:[#allocation2 + $0x128] sm:$0xf]  ;;  %v1902_v22 = vor.u32 %v2601_v0, %v1899_v1 }
  0x1d   :  { %478 = vmatpush.bf16.msrb.mxu3 %v2038_v50  ;;  %452 = vmatpush.bf16.msrb.mxu1 %v2030_v52  ;;  %v2644_v9 = vld [vmem:[#allocation2 + $0x164] sm:$0xf0]  ;;  %v2042_v11 = vor.u32 %v2643_v4, %v2041_v3  ;;  %v2635_v12 = vld [vmem:[#allocation2 + $0x124] sm:$0xf]  ;;  %v2636_v13 = vld [vmem:[#allocation2 + $0x12c] sm:$0xf]  ;;  %v1910_v19 = vor.u32 %v2602_v2, %v1907_v7 }
  0x1e   :  { %v2051_v14 = vld [vmem:[#allocation2 + $0x168] sm:$0xf0]  ;;  %v2050_v15 = vor.u32 %v2644_v9, %v2049_v8  ;;  %v2043_v16 = vld [vmem:[#allocation2 + $0x160] sm:$0xf0]  ;;  %v1977_v17 = vld [vmem:[#allocation2 + $0xa0] sm:$0xf] }
  0x1f   :  { %440 = vmatpush.bf16.msrb.mxu0 %v1962_v53  ;;  %466 = vmatpush.bf16.msrb.mxu2 %v1970_v57  ;;  %v2627_v18 = vld [vmem:[#allocation2 + $0xdc] sm:$0xf0]  ;;  %v1985_v20 = vld [vmem:[#allocation2 + $0xa8] sm:$0xf]  ;;  %v2054_v23 = vor.u32 %v2636_v13, %v2051_v14  ;;  %v2046_v24 = vor.u32 %v2635_v12, %v2043_v16  ;;  %v2620_v26 = vld [vmem:[#allocation2 + $0xac] sm:$0xf] }
  0x20   :  { %v2628_v21 = vld [vmem:[#allocation2 + $0xe4] sm:$0xf0]  ;;  %v1978_v25 = vor.u32 %v2627_v18, %v1977_v17  ;;  %v1987_v27 = vld [vmem:[#allocation2 + $0xe8] sm:$0xf0]  ;;  %v2619_v29 = vld [vmem:[#allocation2 + $0xa4] sm:$0xf] }
  0x21   :  { %479 = vmatpush.bf16.msrb.mxu3 %v1974_v63  ;;  %453 = vmatpush.bf16.msrb.mxu1 %v1966_v5  ;;  %v1986_v28 = vor.u32 %v2628_v21, %v1985_v20  ;;  %v1979_v30 = vld [vmem:[#allocation2 + $0xe0] sm:$0xf0]  ;;  %v1913_v31 = vld [vmem:[#allocation2 + $0x20] sm:$0xf]  ;;  %v1990_v33 = vor.u32 %v2620_v26, %v1987_v27  ;;  %v1921_v34 = vld [vmem:[#allocation2 + $0x28] sm:$0xf] }
  0x22   :  { %v2611_v32 = vld [vmem:[#allocation2 + $0x5c] sm:$0xf0]  ;;  %v2612_v35 = vld [vmem:[#allocation2 + $0x64] sm:$0xf0]  ;;  %v2603_v36 = vld [vmem:[#allocation2 + $0x24] sm:$0xf]  ;;  %v1982_v37 = vor.u32 %v2619_v29, %v1979_v30 }
  0x23   :  { %441 = vmatpush.bf16.msrb.mxu0 %v1898_v6  ;;  %467 = vmatpush.bf16.msrb.mxu2 %v1906_v10  ;;  %v1915_v39 = vld [vmem:[#allocation2 + $0x60] sm:$0xf0]  ;;  %v2604_v40 = vld [vmem:[#allocation2 + $0x2c] sm:$0xf]  ;;  %v2065_v42 = vld [vmem:[#allocation2 + $0x138] sm:$0xf]  ;;  %v1914_v45 = vor.u32 %v2611_v32, %v1913_v31  ;;  %v1922_v49 = vor.u32 %v2612_v35, %v1921_v34 }
  0x24   :  { %v1923_v41 = vld [vmem:[#allocation2 + $0x68] sm:$0xf0]  ;;  %v2646_v43 = vld [vmem:[#allocation2 + $0x174] sm:$0xf0]  ;;  %v2638_v44 = vld [vmem:[#allocation2 + $0x13c] sm:$0xf]  ;;  %v1918_v53 = vor.u32 %v2603_v36, %v1915_v39 }
  0x25   :  { %480 = vmatpush.bf16.msrb.mxu3 %v1910_v19  ;;  %454 = vmatpush.bf16.msrb.mxu1 %v1902_v22  ;;  %v2067_v46 = vld [vmem:[#allocation2 + $0x178] sm:$0xf0]  ;;  %v2057_v47 = vld [vmem:[#allocation2 + $0x130] sm:$0xf]  ;;  %v1926_v50 = vor.u32 %v2604_v40, %v1923_v41  ;;  %v2637_v51 = vld [vmem:[#allocation2 + $0x134] sm:$0xf]  ;;  %v2066_v54 = vor.u32 %v2646_v43, %v2065_v42 }
  0x26   :  { %v2645_v48 = vld [vmem:[#allocation2 + $0x16c] sm:$0xf0]  ;;  %v2059_v52 = vld [vmem:[#allocation2 + $0x170] sm:$0xf0]  ;;  %v2070_v55 = vor.u32 %v2638_v44, %v2067_v46  ;;  %v2001_v56 = vld [vmem:[#allocation2 + $0xb8] sm:$0xf] }
  0x27   :  { %491 = vmatpush.bf16.msra.mxu0 %v2042_v11  ;;  %517 = vmatpush.bf16.msra.mxu2 %v2050_v15  ;;  %v2630_v57 = vld [vmem:[#allocation2 + $0xf4] sm:$0xf0]  ;;  %v2622_v58 = vld [vmem:[#allocation2 + $0xbc] sm:$0xf]  ;;  %v2058_v59 = vor.u32 %v2645_v48, %v2057_v47  ;;  %v2062_v61 = vor.u32 %v2637_v51, %v2059_v52  ;;  %v1993_v62 = vld [vmem:[#allocation2 + $0xb0] sm:$0xf] }
  0x28   :  { %v2003_v60 = vld [vmem:[#allocation2 + $0xf8] sm:$0xf0]  ;;  %v2629_v63 = vld [vmem:[#allocation2 + $0xec] sm:$0xf0]  ;;  %v2621_v0 = vld [vmem:[#allocation2 + $0xb4] sm:$0xf]  ;;  %v2002_v2 = vor.u32 %v2630_v57, %v2001_v56 }
  0x29   :  { %530 = vmatpush.bf16.msra.mxu3 %v2054_v23  ;;  %504 = vmatpush.bf16.msra.mxu1 %v2046_v24  ;;  %v1995_v1 = vld [vmem:[#allocation2 + $0xf0] sm:$0xf0]  ;;  %v2006_v3 = vor.u32 %v2622_v58, %v2003_v60  ;;  %v1937_v4 = vld [vmem:[#allocation2 + $0x38] sm:$0xf]  ;;  %v2606_v6 = vld [vmem:[#allocation2 + $0x3c] sm:$0xf]  ;;  %v1994_v7 = vor.u32 %v2629_v63, %v1993_v62 }
  0x2a   :  { %2075 = vmatmul.msk.bf16.vlgmr.msrb.gmra.mxu0 %vm378_vm0, %v2879_v38  ;;  %2077 = vmatmul.msk.bf16.vlgmr.msrb.gmra.mxu2 %vm378_vm0, %v2879_v38  ;;  %v2614_v5 = vld [vmem:[#allocation2 + $0x74] sm:$0xf0]  ;;  %v1939_v8 = vld [vmem:[#allocation2 + $0x78] sm:$0xf0]  ;;  %v1998_v9 = vor.u32 %v2621_v0, %v1995_v1  ;;  %v1929_v10 = vld [vmem:[#allocation2 + $0x30] sm:$0xf] }
  0x2b   :  { %492 = vmatpush.bf16.msra.mxu0 %v1978_v25  ;;  %518 = vmatpush.bf16.msra.mxu2 %v1986_v28  ;;  %v2613_v11 = vld [vmem:[#allocation2 + $0x6c] sm:$0xf0]  ;;  %v2605_v12 = vld [vmem:[#allocation2 + $0x34] sm:$0xf]  ;;  %v1938_v14 = vor.u32 %v2614_v5, %v1937_v4  ;;  %v1942_v15 = vor.u32 %v2606_v6, %v1939_v8  ;;  %v2654_v18 = vld [vmem:[#allocation4 + $0x38] sm:$0xff] }
  0x2c   :  { %2078 = vmatmul.msk.bf16.vlgmr.msrb.gmra.mxu3 %vm378_vm0, %v2879_v38  ;;  %2076 = vmatmul.msk.bf16.vlgmr.msrb.gmra.mxu1 %vm378_vm0, %v2879_v38  ;;  %v1931_v13 = vld [vmem:[#allocation2 + $0x70] sm:$0xf0]  ;;  %v1930_v16 = vor.u32 %v2613_v11, %v1929_v10  ;;  %v2662_v19 = vld [vmem:[#allocation4 + $0x78] sm:$0xff]  ;;  %v2652_v26 = vld [vmem:[#allocation4 + $0x28] sm:$0xff] }
  0x2d   :  { %531 = vmatpush.bf16.msra.mxu3 %v1990_v33  ;;  %505 = vmatpush.bf16.msra.mxu1 %v1982_v37  ;;  %v1934_v17 = vor.u32 %v2605_v12, %v1931_v13  ;;  %v2670_v20 = vld [vmem:[#allocation4 + $0xb8] sm:$0xff]  ;;  %v2653_v22 = vld [vmem:[#allocation4 + $0x30] sm:$0xff]  ;;  %v2660_v27 = vld [vmem:[#allocation4 + $0x68] sm:$0xff] }
  0x2e   :  { %v2678_v21 = vld [vmem:[#allocation4 + $0xf8] sm:$0xff]  ;;  %v2661_v23 = vld [vmem:[#allocation4 + $0x70] sm:$0xff]  ;;  %v2668_v28 = vld [vmem:[#allocation4 + $0xa8] sm:$0xff] }
  0x2f   :  { %493 = vmatpush.bf16.msra.mxu0 %v1914_v45  ;;  %519 = vmatpush.bf16.msra.mxu2 %v1922_v49  ;;  %v2669_v24 = vld [vmem:[#allocation4 + $0xb0] sm:$0xff]  ;;  %v2676_v29 = vld [vmem:[#allocation4 + $0xe8] sm:$0xff]  ;;  %v2651_v30 = vld [vmem:[#allocation4 + $0x20] sm:$0xff] }
  0x30   :  { %v2677_v25 = vld [vmem:[#allocation4 + $0xf0] sm:$0xff]  ;;  %v2659_v31 = vld [vmem:[#allocation4 + $0x60] sm:$0xff]  ;;  %v2650_v34 = vld [vmem:[#allocation4 + $0x18] sm:$0xff] }
  0x31   :  { %532 = vmatpush.bf16.msra.mxu3 %v1926_v50  ;;  %506 = vmatpush.bf16.msra.mxu1 %v1918_v53  ;;  %v2667_v32 = vld [vmem:[#allocation4 + $0xa0] sm:$0xff]  ;;  %v2658_v35 = vld [vmem:[#allocation4 + $0x58] sm:$0xff]  ;;  %v2649_v39 = vld [vmem:[#allocation4 + $0x10] sm:$0xff] }
  0x32   :  { %v2675_v33 = vld [vmem:[#allocation4 + $0xe0] sm:$0xff]  ;;  %v2666_v36 = vld [vmem:[#allocation4 + $0x98] sm:$0xff]  ;;  %v2657_v40 = vld [vmem:[#allocation4 + $0x50] sm:$0xff] }
  0x33   :  { %569 = vmatpush.bf16.msrb.mxu2 %v2066_v54  ;;  %543 = vmatpush.bf16.msrb.mxu0 %v2058_v59  ;;  %v2674_v37 = vld [vmem:[#allocation4 + $0xd8] sm:$0xff]  ;;  %v2665_v41 = vld [vmem:[#allocation4 + $0x90] sm:$0xff]  ;;  %v2648_v43 = vld [vmem:[#allocation4 + $0x8] sm:$0xff] }
  0x34   :  { %v2673_v42 = vld [vmem:[#allocation4 + $0xd0] sm:$0xff]  ;;  %v2656_v44 = vld [vmem:[#allocation4 + $0x48] sm:$0xff]  ;;  %v2647_v47 = vld [vmem:[#allocation4] sm:$0xff] }
  0x35   :  { %582 = vmatpush.bf16.msrb.mxu3 %v2070_v55  ;;  %556 = vmatpush.bf16.msrb.mxu1 %v2062_v61  ;;  %v2664_v45 = vld [vmem:[#allocation4 + $0x88] sm:$0xff]  ;;  %v2655_v48 = vld [vmem:[#allocation4 + $0x40] sm:$0xff]  ;;  %v2694_v49 = vld [vmem:[#allocation4 + $0x178] sm:$0xff] }
  0x36   :  { %v2672_v46 = vld [vmem:[#allocation4 + $0xc8] sm:$0xff]  ;;  %v2663_v50 = vld [vmem:[#allocation4 + $0x80] sm:$0xff]  ;;  %v2702_v52 = vld [vmem:[#allocation4 + $0x1b8] sm:$0xff] }
  0x37   :  { %570 = vmatpush.bf16.msrb.mxu2 %v2002_v2  ;;  %544 = vmatpush.bf16.msrb.mxu0 %v1994_v7  ;;  %v2671_v51 = vld [vmem:[#allocation4 + $0xc0] sm:$0xff]  ;;  %v2710_v53 = vld [vmem:[#allocation4 + $0x1f8] sm:$0xff]  ;;  %v2685_v54 = vld [vmem:[#allocation4 + $0x130] sm:$0xff] }
  0x38   :  { %v2693_v55 = vld [vmem:[#allocation4 + $0x170] sm:$0xff]  ;;  %v2684_v58 = vld [vmem:[#allocation4 + $0x128] sm:$0xff]  ;;  %v2683_v62 = vld [vmem:[#allocation4 + $0x120] sm:$0xff] }
  0x39   :  { %583 = vmatpush.bf16.msrb.mxu3 %v2006_v3  ;;  %557 = vmatpush.bf16.msrb.mxu1 %v1998_v9  ;;  %v2701_v56 = vld [vmem:[#allocation4 + $0x1b0] sm:$0xff]  ;;  %v2692_v59 = vld [vmem:[#allocation4 + $0x168] sm:$0xff]  ;;  %v2691_v63 = vld [vmem:[#allocation4 + $0x160] sm:$0xff] }
  0x3a   :  { %2079 = vmatmul.msk.bf16.vlgmr.msra.gmra.mxu0 %vm378_vm0, %v2879_v38  ;;  %2081 = vmatmul.msk.bf16.vlgmr.msra.gmra.mxu2 %vm378_vm0, %v2879_v38  ;;  %v2709_v57 = vld [vmem:[#allocation4 + $0x1f0] sm:$0xff]  ;;  %v2700_v60 = vld [vmem:[#allocation4 + $0x1a8] sm:$0xff]  ;;  %v2699_v0 = vld [vmem:[#allocation4 + $0x1a0] sm:$0xff] }
  0x3b   :  { %571 = vmatpush.bf16.msrb.mxu2 %v1938_v14  ;;  %545 = vmatpush.bf16.msrb.mxu0 %v1930_v16  ;;  %v2708_v61 = vld [vmem:[#allocation4 + $0x1e8] sm:$0xff]  ;;  %v2707_v1 = vld [vmem:[#allocation4 + $0x1e0] sm:$0xff]  ;;  %v2682_v2 = vld [vmem:[#allocation4 + $0x118] sm:$0xff] }
  0x3c   :  { %2082 = vmatmul.msk.bf16.vlgmr.msra.gmra.mxu3 %vm378_vm0, %v2879_v38  ;;  %2080 = vmatmul.msk.bf16.vlgmr.msra.gmra.mxu1 %vm378_vm0, %v2879_v38  ;;  %v2690_v3 = vld [vmem:[#allocation4 + $0x158] sm:$0xff]  ;;  %v2681_v4 = vld [vmem:[#allocation4 + $0x110] sm:$0xff]  ;;  %v2680_v8 = vld [vmem:[#allocation4 + $0x108] sm:$0xff] }
  0x3d   :  { %584 = vmatpush.bf16.msrb.mxu3 %v1942_v15  ;;  %558 = vmatpush.bf16.msrb.mxu1 %v1934_v17  ;;  %v2689_v5 = vld [vmem:[#allocation4 + $0x150] sm:$0xff]  ;;  %v2698_v6 = vld [vmem:[#allocation4 + $0x198] sm:$0xff]  ;;  %v2688_v9 = vld [vmem:[#allocation4 + $0x148] sm:$0xff] }
  0x3e   :  { %v2706_v7 = vld [vmem:[#allocation4 + $0x1d8] sm:$0xff]  ;;  %v2697_v10 = vld [vmem:[#allocation4 + $0x190] sm:$0xff]  ;;  %v2679_v12 = vld [vmem:[#allocation4 + $0x100] sm:$0xff] }
  0x3f   :  { %1648 = vmatpush.bf16.msra.mxu0 %v2654_v18  ;;  %1674 = vmatpush.bf16.msra.mxu2 %v2670_v20  ;;  %v2705_v11 = vld [vmem:[#allocation4 + $0x1d0] sm:$0xff]  ;;  %v2687_v13 = vld [vmem:[#allocation4 + $0x140] sm:$0xff]  ;;  %v2696_v14 = vld [vmem:[#allocation4 + $0x188] sm:$0xff] }
  0x40   :  { %v2704_v15 = vld [vmem:[#allocation4 + $0x1c8] sm:$0xff]  ;;  %v2695_v16 = vld [vmem:[#allocation4 + $0x180] sm:$0xff] }
  0x41   :  { %1661 = vmatpush.bf16.msra.mxu1 %v2662_v19  ;;  %1687 = vmatpush.bf16.msra.mxu3 %v2678_v21  ;;  %v2703_v17 = vld [vmem:[#allocation4 + $0x1c0] sm:$0xff] }
  0x42   :  { %v2916_v18 = vld [vmem:[%s2947_s2] sm:$0xff] }
  0x43   :  { %1649 = vmatpush.bf16.msra.mxu0 %v2653_v22  ;;  %1675 = vmatpush.bf16.msra.mxu2 %v2669_v24  ;;  %v106_v19 = vperm.slane %v2916_v18, 0  ;;  %v107_v20 = vperm.slane %v2916_v18, 1 }
  0x45   :  { %1662 = vmatpush.bf16.msra.mxu1 %v2661_v23  ;;  %1688 = vmatpush.bf16.msra.mxu3 %v2677_v25 }
  0x47   :  { %1650 = vmatpush.bf16.msra.mxu0 %v2652_v26  ;;  %1676 = vmatpush.bf16.msra.mxu2 %v2668_v28  ;;  %v108_v26 = vperm.slane %v2916_v18, 2  ;;  %v2718_v28 = vld [vmem:[#allocation4 + $0x238] sm:$0xff] }
  0x49   :  { %1663 = vmatpush.bf16.msra.mxu1 %v2660_v27  ;;  %1689 = vmatpush.bf16.msra.mxu3 %v2676_v29  ;;  %v109_v27 = vperm.slane %v2916_v18, 3 }
  0x4a   :  { %2083 = vmatmul.msk.bf16.vlgmr.msrb.gmra.mxu0 %vm378_vm0, %v2879_v38  ;;  %2085 = vmatmul.msk.bf16.vlgmr.msrb.gmra.mxu2 %vm378_vm0, %v2879_v38 }
  0x4b   :  { %1651 = vmatpush.bf16.msra.mxu0 %v2651_v30  ;;  %1677 = vmatpush.bf16.msra.mxu2 %v2667_v32 }
  0x4c   :  { %2086 = vmatmul.msk.bf16.vlgmr.msrb.gmra.mxu3 %vm378_vm0, %v2879_v38  ;;  %2084 = vmatmul.msk.bf16.vlgmr.msrb.gmra.mxu1 %vm378_vm0, %v2879_v38  ;;  %v2686_v38 = vld [vmem:[#allocation4 + $0x138] sm:$0xff] }
  0x4d   :  { %1664 = vmatpush.bf16.msra.mxu1 %v2659_v31  ;;  %1690 = vmatpush.bf16.msra.mxu3 %v2675_v33  ;;  %v2726_v31 = vld [vmem:[#allocation4 + $0x278] sm:$0xff] }
  0x4f   :  { %1652 = vmatpush.bf16.msra.mxu0 %v2650_v34  ;;  %1678 = vmatpush.bf16.msra.mxu2 %v2666_v36 }
  0x51   :  { %1665 = vmatpush.bf16.msra.mxu1 %v2658_v35  ;;  %1691 = vmatpush.bf16.msra.mxu3 %v2674_v37 }
  0x53   :  { %1653 = vmatpush.bf16.msra.mxu0 %v2649_v39  ;;  %1679 = vmatpush.bf16.msra.mxu2 %v2665_v41  ;;  %v2717_v39 = vld [vmem:[#allocation4 + $0x230] sm:$0xff] }
  0x55   :  { %1666 = vmatpush.bf16.msra.mxu1 %v2657_v40  ;;  %1692 = vmatpush.bf16.msra.mxu3 %v2673_v42 }
  0x57   :  { %1654 = vmatpush.bf16.msra.mxu0 %v2648_v43  ;;  %1680 = vmatpush.bf16.msra.mxu2 %v2664_v45  ;;  %v2725_v43 = vld [vmem:[#allocation4 + $0x270] sm:$0xff] }
  0x59   :  { %1667 = vmatpush.bf16.msra.mxu1 %v2656_v44  ;;  %1693 = vmatpush.bf16.msra.mxu3 %v2672_v46  ;;  %v2734_v44 = vld [vmem:[#allocation4 + $0x2b8] sm:$0xff] }
  0x5b   :  { %1655 = vmatpush.bf16.msra.mxu0 %v2647_v47  ;;  %1681 = vmatpush.bf16.msra.mxu2 %v2663_v50  ;;  %v2742_v47 = vld [vmem:[#allocation4 + $0x2f8] sm:$0xff] }
  0x5d   :  { %1668 = vmatpush.bf16.msra.mxu1 %v2655_v48  ;;  %1694 = vmatpush.bf16.msra.mxu3 %v2671_v51  ;;  %v110_v48 = vperm.slane %v2916_v18, 4  ;;  %v2724_v51 = vld [vmem:[#allocation4 + $0x268] sm:$0xff] }
  0x5f   :  { %1700 = vmatpush.bf16.msrb.mxu0 %v2686_v38  ;;  %1726 = vmatpush.bf16.msrb.mxu2 %v2702_v52  ;;  %v2716_v38 = vld [vmem:[#allocation4 + $0x228] sm:$0xff]  ;;  %v2733_v52 = vld [vmem:[#allocation4 + $0x2b0] sm:$0xff] }
  0x61   :  { %1713 = vmatpush.bf16.msrb.mxu1 %v2694_v49  ;;  %1739 = vmatpush.bf16.msrb.mxu3 %v2710_v53  ;;  %v111_v53 = vperm.slane %v2916_v18, 5 }
  0x63   :  { %1701 = vmatpush.bf16.msrb.mxu0 %v2685_v54  ;;  %1727 = vmatpush.bf16.msrb.mxu2 %v2701_v56  ;;  %v2715_v56 = vld [vmem:[#allocation4 + $0x220] sm:$0xff] }
  0x65   :  { %1714 = vmatpush.bf16.msrb.mxu1 %v2693_v55  ;;  %1740 = vmatpush.bf16.msrb.mxu3 %v2709_v57  ;;  %v2741_v55 = vld [vmem:[#allocation4 + $0x2f0] sm:$0xff] }
  0x67   :  { %1702 = vmatpush.bf16.msrb.mxu0 %v2684_v58  ;;  %1728 = vmatpush.bf16.msrb.mxu2 %v2700_v60 }
  0x69   :  { %1715 = vmatpush.bf16.msrb.mxu1 %v2692_v59  ;;  %1741 = vmatpush.bf16.msrb.mxu3 %v2708_v61  ;;  %v2723_v61 = vld [vmem:[#allocation4 + $0x260] sm:$0xff] }
  0x6b   :  { %1703 = vmatpush.bf16.msrb.mxu0 %v2683_v62  ;;  %1729 = vmatpush.bf16.msrb.mxu2 %v2699_v0  ;;  %v2732_v62 = vld [vmem:[#allocation4 + $0x2a8] sm:$0xff]  ;;  %v112_v0 = vperm.slane %v2916_v18, 6 }
  0x6d   :  { %1716 = vmatpush.bf16.msrb.mxu1 %v2691_v63  ;;  %1742 = vmatpush.bf16.msrb.mxu3 %v2707_v1  ;;  %v2740_v63 = vld [vmem:[#allocation4 + $0x2e8] sm:$0xff]  ;;  %v113_v1 = vperm.slane %v2916_v18, 7 }
  0x6e   :  { %v2929_v18 = vld [vmem:[%s2947_s2 + $0x8] sm:$0xff] }
  0x6f   :  { %1704 = vmatpush.bf16.msrb.mxu0 %v2682_v2  ;;  %1730 = vmatpush.bf16.msrb.mxu2 %v2698_v6 }
  0x71   :  { %1717 = vmatpush.bf16.msrb.mxu1 %v2690_v3  ;;  %1743 = vmatpush.bf16.msrb.mxu3 %v2706_v7 }
  0x73   :  { %1705 = vmatpush.bf16.msrb.mxu0 %v2681_v4  ;;  %1731 = vmatpush.bf16.msrb.mxu2 %v2697_v10  ;;  %v2714_v4 = vld [vmem:[#allocation4 + $0x218] sm:$0xff] }
  0x75   :  { %1718 = vmatpush.bf16.msrb.mxu1 %v2689_v5  ;;  %1744 = vmatpush.bf16.msrb.mxu3 %v2705_v11 }
  0x77   :  { %1706 = vmatpush.bf16.msrb.mxu0 %v2680_v8  ;;  %1732 = vmatpush.bf16.msrb.mxu2 %v2696_v14  ;;  %v2722_v8 = vld [vmem:[#allocation4 + $0x258] sm:$0xff]  ;;  %v2713_v14 = vld [vmem:[#allocation4 + $0x210] sm:$0xff] }
  0x79   :  { %1719 = vmatpush.bf16.msrb.mxu1 %v2688_v9  ;;  %1745 = vmatpush.bf16.msrb.mxu3 %v2704_v15  ;;  %v2731_v9 = vld [vmem:[#allocation4 + $0x2a0] sm:$0xff] }
  0x7b   :  { %1707 = vmatpush.bf16.msrb.mxu0 %v2679_v12  ;;  %1733 = vmatpush.bf16.msrb.mxu2 %v2695_v16 }
  0x7d   :  { %1720 = vmatpush.bf16.msrb.mxu1 %v2687_v13  ;;  %1746 = vmatpush.bf16.msrb.mxu3 %v2703_v17  ;;  %v2739_v13 = vld [vmem:[#allocation4 + $0x2e0] sm:$0xff] }
  0x97   :  { %v391_v21 = vpop.f32.mrf.mxu0 }
  0x98   :  { %v392_v22 = vadd.f32 %v391_v21, %v106_v19  ;;  %v2721_v19 = vld [vmem:[#allocation4 + $0x250] sm:$0xff] }
  0x99   :  { %v404_v23 = vpop.f32.mrf.mxu1 }
  0x9a   :  { %v590_v24 = vmax.f32 %v392_v22, 0.0  ;;  %v405_v25 = vadd.f32 %v404_v23, %v107_v20  ;;  %v2730_v20 = vld [vmem:[#allocation4 + $0x298] sm:$0xff] }
  0x9b   :  { %v2738_v23 = vld [vmem:[#allocation4 + $0x2d8] sm:$0xff] }
  0x9c   :  { %v606_v29 = vpack.c.bf16 %v590_v24, %v590_v24  ;;  %v591_v30 = vmax.f32 %v405_v25, 0.0  ;;  %v2712_v24 = vld [vmem:[#allocation4 + $0x208] sm:$0xff]  ;;  %v114_v25 = vperm.slane %v2929_v18, 0 }
  0x9d   :  { %v417_v33 = vpop.f32.mrf.mxu2 }
  0x9e   :  { %v607_v32 = vpack.c.bf16 %v591_v30, %v591_v30  ;;  %1656 = vmatmul.bf16.vlgmr.msra.gmra.mxu0 %v606_v29  ;;  %v418_v35 = vadd.f32 %v417_v33, %v108_v26  ;;  %v2729_v29 = vld [vmem:[#allocation4 + $0x290] sm:$0xff]  ;;  %v115_v30 = vperm.slane %v2929_v18, 1 }
  0x9f   :  { %v430_v34 = vpop.f32.mrf.mxu3  ;;  %1752 = vmatpush.bf16.msra.mxu0 %v2718_v28  ;;  %v393_v37 = vpop.f32.mrf.mxu0  ;;  %v2720_v28 = vld [vmem:[#allocation4 + $0x248] sm:$0xff] }
  0xa0   :  { %v431_v36 = vadd.f32 %v430_v34, %v109_v27  ;;  %1669 = vmatmul.bf16.vlgmr.msra.gmra.mxu1 %v607_v32  ;;  %v592_v40 = vmax.f32 %v418_v35, 0.0  ;;  %v2737_v32 = vld [vmem:[#allocation4 + $0x2d0] sm:$0xff]  ;;  %v2711_v34 = vld [vmem:[#allocation4 + $0x200] sm:$0xff] }
  0xa1   :  { %1765 = vmatpush.bf16.msra.mxu1 %v2726_v31  ;;  %v406_v42 = vpop.f32.mrf.mxu1 }
  0xa2   :  { %v593_v41 = vmax.f32 %v431_v36, 0.0  ;;  %v608_v45 = vpack.c.bf16 %v592_v40, %v592_v40  ;;  %v2750_v36 = vld [vmem:[#allocation4 + $0x338] sm:$0xff]  ;;  %v2719_v40 = vld [vmem:[#allocation4 + $0x240] sm:$0xff]  ;;  %v2736_v42 = vld [vmem:[#allocation4 + $0x2c8] sm:$0xff] }
  0xa3   :  { %1753 = vmatpush.bf16.msra.mxu0 %v2717_v39 }
  0xa4   :  { %v609_v46 = vpack.c.bf16 %v593_v41, %v593_v41  ;;  %1682 = vmatmul.bf16.vlgmr.msra.gmra.mxu2 %v608_v45  ;;  %v2728_v41 = vld [vmem:[#allocation4 + $0x288] sm:$0xff]  ;;  %v117_v45 = vperm.slane %v2929_v18, 3 }
  0xa5   :  { %1766 = vmatpush.bf16.msra.mxu1 %v2725_v43  ;;  %1778 = vmatpush.bf16.msra.mxu2 %v2734_v44  ;;  %v419_v49 = vpop.f32.mrf.mxu2  ;;  %v116_v43 = vperm.slane %v2929_v18, 2  ;;  %v2758_v44 = vld [vmem:[#allocation4 + $0x378] sm:$0xff] }
  0xa6   :  { %1695 = vmatmul.bf16.vlgmr.msra.gmra.mxu3 %v609_v46 }
  0xa7   :  { %v432_v50 = vpop.f32.mrf.mxu3  ;;  %1791 = vmatpush.bf16.msra.mxu3 %v2742_v47  ;;  %1754 = vmatpush.bf16.msra.mxu0 %v2716_v38  ;;  %v443_v54 = vpop.f32.mrf.mxu0  ;;  %v2749_v38 = vld [vmem:[#allocation4 + $0x330] sm:$0xff] }
  0xa8   :  { %v444_v57 = vadd.f32 %v443_v54, %v110_v48  ;;  %v2735_v54 = vld [vmem:[#allocation4 + $0x2c0] sm:$0xff] }
  0xa9   :  { %v456_v58 = vpop.f32.mrf.mxu1  ;;  %1767 = vmatpush.bf16.msra.mxu1 %v2724_v51  ;;  %1779 = vmatpush.bf16.msra.mxu2 %v2733_v52  ;;  %v2727_v51 = vld [vmem:[#allocation4 + $0x280] sm:$0xff] }
  0xaa   :  { %v594_v59 = vmax.f32 %v444_v57, 0.0  ;;  %v457_v60 = vadd.f32 %v456_v58, %v111_v53  ;;  %v2766_v57 = vld [vmem:[#allocation4 + $0x3b8] sm:$0xff] }
  0xab   :  { %1792 = vmatpush.bf16.msra.mxu3 %v2741_v55  ;;  %1755 = vmatpush.bf16.msra.mxu0 %v2715_v56  ;;  %v2757_v55 = vld [vmem:[#allocation4 + $0x370] sm:$0xff]  ;;  %v2774_v58 = vld [vmem:[#allocation4 + $0x3f8] sm:$0xff] }
  0xac   :  { %v610_v2 = vpack.c.bf16 %v594_v59, %v594_v59  ;;  %v595_v3 = vmax.f32 %v457_v60, 0.0 }
  0xad   :  { %1768 = vmatpush.bf16.msra.mxu1 %v2723_v61  ;;  %1780 = vmatpush.bf16.msra.mxu2 %v2732_v62  ;;  %v469_v6 = vpop.f32.mrf.mxu2  ;;  %v2748_v61 = vld [vmem:[#allocation4 + $0x328] sm:$0xff] }
  0xae   :  { %v611_v5 = vpack.c.bf16 %v595_v3, %v595_v3  ;;  %v470_v10 = vadd.f32 %v469_v6, %v112_v0  ;;  %1708 = vmatmul.bf16.vlgmr.msrb.gmra.mxu0 %v610_v2  ;;  %v2765_v2 = vld [vmem:[#allocation4 + $0x3b0] sm:$0xff] }
  0xaf   :  { %v482_v7 = vpop.f32.mrf.mxu3  ;;  %1793 = vmatpush.bf16.msra.mxu3 %v2740_v63  ;;  %v445_v11 = vpop.f32.mrf.mxu0  ;;  %1756 = vmatpush.bf16.msra.mxu0 %v2714_v4  ;;  %v2773_v3 = vld [vmem:[#allocation4 + $0x3f0] sm:$0xff]  ;;  %v2747_v4 = vld [vmem:[#allocation4 + $0x320] sm:$0xff] }
  0xb0   :  { %v483_v12 = vadd.f32 %v482_v7, %v113_v1  ;;  %1721 = vmatmul.bf16.vlgmr.msrb.gmra.mxu1 %v611_v5  ;;  %v596_v15 = vmax.f32 %v470_v10, 0.0  ;;  %v2756_v1 = vld [vmem:[#allocation4 + $0x368] sm:$0xff]  ;;  %v2755_v7 = vld [vmem:[#allocation4 + $0x360] sm:$0xff]  ;;  %v2746_v11 = vld [vmem:[#allocation4 + $0x318] sm:$0xff] }
  0xb1   :  { %v458_v17 = vpop.f32.mrf.mxu1  ;;  %1769 = vmatpush.bf16.msra.mxu1 %v2722_v8  ;;  %1781 = vmatpush.bf16.msra.mxu2 %v2731_v9  ;;  %v2764_v9 = vld [vmem:[#allocation4 + $0x3a8] sm:$0xff] }
  0xb2   :  { %v597_v16 = vmax.f32 %v483_v12, 0.0  ;;  %v612_v21 = vpack.c.bf16 %v596_v15, %v596_v15  ;;  %v2772_v10 = vld [vmem:[#allocation4 + $0x3e8] sm:$0xff]  ;;  %v2771_v15 = vld [vmem:[#allocation4 + $0x3e0] sm:$0xff]  ;;  %v118_v17 = vperm.slane %v2929_v18, 4 }
  0xb3   :  { %1794 = vmatpush.bf16.msra.mxu3 %v2739_v13  ;;  %1757 = vmatpush.bf16.msra.mxu0 %v2713_v14  ;;  %v2754_v13 = vld [vmem:[#allocation4 + $0x358] sm:$0xff]  ;;  %v2763_v14 = vld [vmem:[#allocation4 + $0x3a0] sm:$0xff] }
  0xb4   :  { %v613_v22 = vpack.c.bf16 %v597_v16, %v597_v16  ;;  %1734 = vmatmul.bf16.vlgmr.msrb.gmra.mxu2 %v612_v21  ;;  %v2745_v16 = vld [vmem:[#allocation4 + $0x310] sm:$0xff]  ;;  %v119_v21 = vperm.slane %v2929_v18, 5 }
  0xb5   :  { %1770 = vmatpush.bf16.msra.mxu1 %v2721_v19  ;;  %1782 = vmatpush.bf16.msra.mxu2 %v2730_v20  ;;  %v471_v26 = vpop.f32.mrf.mxu2 }
  0xb6   :  { %1747 = vmatmul.bf16.vlgmr.msrb.gmra.mxu3 %v613_v22  ;;  %v2753_v22 = vld [vmem:[#allocation4 + $0x350] sm:$0xff] }
  0xb7   :  { %v484_v27 = vpop.f32.mrf.mxu3  ;;  %1795 = vmatpush.bf16.msra.mxu3 %v2738_v23  ;;  %v495_v31 = vpop.f32.mrf.mxu0  ;;  %1758 = vmatpush.bf16.msra.mxu0 %v2712_v24  ;;  %v2762_v24 = vld [vmem:[#allocation4 + $0x398] sm:$0xff] }
  0xb8   :  { %v496_v33 = vadd.f32 %v495_v31, %v114_v25  ;;  %v2770_v25 = vld [vmem:[#allocation4 + $0x3d8] sm:$0xff]  ;;  %v2744_v27 = vld [vmem:[#allocation4 + $0x308] sm:$0xff]  ;;  %v121_v31 = vperm.slane %v2929_v18, 7 }
  0xb9   :  { %v508_v35 = vpop.f32.mrf.mxu1  ;;  %1771 = vmatpush.bf16.msra.mxu1 %v2720_v28  ;;  %1783 = vmatpush.bf16.msra.mxu2 %v2729_v29 }
  0xba   :  { %v598_v37 = vmax.f32 %v496_v33, 0.0  ;;  %v509_v39 = vadd.f32 %v508_v35, %v115_v30  ;;  %v120_v30 = vperm.slane %v2929_v18, 6  ;;  %v2761_v33 = vld [vmem:[#allocation4 + $0x390] sm:$0xff] }
  0xbb   :  { %1796 = vmatpush.bf16.msra.mxu3 %v2737_v32  ;;  %1759 = vmatpush.bf16.msra.mxu0 %v2711_v34  ;;  %v2752_v32 = vld [vmem:[#allocation4 + $0x348] sm:$0xff]  ;;  %v2769_v34 = vld [vmem:[#allocation4 + $0x3d0] sm:$0xff] }
  0xbc   :  { %v614_v46 = vpack.c.bf16 %v598_v37, %v598_v37  ;;  %v599_v47 = vmax.f32 %v509_v39, 0.0 }
  0xbd   :  { %1772 = vmatpush.bf16.msra.mxu1 %v2719_v40  ;;  %1784 = vmatpush.bf16.msra.mxu2 %v2728_v41  ;;  %v521_v49 = vpop.f32.mrf.mxu2 }
  0xbe   :  { %v615_v48 = vpack.c.bf16 %v599_v47, %v599_v47  ;;  %v522_v52 = vadd.f32 %v521_v49, %v116_v43  ;;  %1760 = vmatmul.bf16.vlgmr.msra.gmra.mxu0 %v614_v46  ;;  %v2751_v43 = vld [vmem:[#allocation4 + $0x340] sm:$0xff] }
  0xbf   :  { %1804 = vmatpush.bf16.msrb.mxu0 %v2750_v36  ;;  %v534_v50 = vpop.f32.mrf.mxu3  ;;  %1797 = vmatpush.bf16.msra.mxu3 %v2736_v42  ;;  %v497_v56 = vpop.f32.mrf.mxu0  ;;  %v2743_v36 = vld [vmem:[#allocation4 + $0x300] sm:$0xff] }
  0xc0   :  { %v535_v53 = vadd.f32 %v534_v50, %v117_v45  ;;  %v600_v59 = vmax.f32 %v522_v52, 0.0  ;;  %1773 = vmatmul.bf16.vlgmr.msra.gmra.mxu1 %v615_v48  ;;  %v2768_v45 = vld [vmem:[#allocation4 + $0x3c8] sm:$0xff]  ;;  %v2759_v48 = vld [vmem:[#allocation4 + $0x380] sm:$0xff] }
  0xc1   :  { %1817 = vmatpush.bf16.msrb.mxu1 %v2758_v44  ;;  %v510_v62 = vpop.f32.mrf.mxu1  ;;  %1785 = vmatpush.bf16.msra.mxu2 %v2727_v51  ;;  %v2760_v44 = vld [vmem:[#allocation4 + $0x388] sm:$0xff]  ;;  %v2767_v49 = vld [vmem:[#allocation4 + $0x3c0] sm:$0xff] }
  0xc2   :  { %v601_v60 = vmax.f32 %v535_v53, 0.0  ;;  %v616_v63 = vpack.c.bf16 %v600_v59, %v600_v59 }
  0xc3   :  { %1805 = vmatpush.bf16.msrb.mxu0 %v2749_v38  ;;  %1798 = vmatpush.bf16.msra.mxu3 %v2735_v54 }
  0xc4   :  { %v617_v0 = vpack.c.bf16 %v601_v60, %v601_v60  ;;  %1786 = vmatmul.bf16.vlgmr.msra.gmra.mxu2 %v616_v63  ;;  %v878_v60 = vld [vmem:[%s2949_s4] sm:$0x7] }
  0xc5   :  { %1818 = vmatpush.bf16.msrb.mxu1 %v2757_v55  ;;  %1830 = vmatpush.bf16.msrb.mxu2 %v2766_v57  ;;  %v523_v5 = vpop.f32.mrf.mxu2  ;;  %v879_v63 = vperm.slane %v878_v60, 0 }
  0xc6   :  { %1799 = vmatmul.bf16.vlgmr.msra.gmra.mxu3 %v617_v0 }
  0xc7   :  { %1843 = vmatpush.bf16.msrb.mxu3 %v2774_v58  ;;  %1806 = vmatpush.bf16.msrb.mxu0 %v2748_v61  ;;  %v536_v6 = vpop.f32.mrf.mxu3  ;;  %v547_v8 = vpop.f32.mrf.mxu0 }
  0xc8   :  { %v548_v26 = vadd.f32 %v547_v8, %v118_v17 }
  0xc9   :  { %1819 = vmatpush.bf16.msrb.mxu1 %v2756_v1  ;;  %1831 = vmatpush.bf16.msrb.mxu2 %v2765_v2  ;;  %v560_v12 = vpop.f32.mrf.mxu1 }
  0xca   :  { %v561_v29 = vadd.f32 %v560_v12, %v119_v21  ;;  %v602_v35 = vmax.f32 %v548_v26, 0.0 }
  0xcb   :  { %1844 = vmatpush.bf16.msrb.mxu3 %v2773_v3  ;;  %1807 = vmatpush.bf16.msrb.mxu0 %v2747_v4 }
  0xcc   :  { %v603_v37 = vmax.f32 %v561_v29, 0.0  ;;  %v618_v18 = vpack.c.bf16 %v602_v35, %v602_v35 }
  0xcd   :  { %1820 = vmatpush.bf16.msrb.mxu1 %v2755_v7  ;;  %1832 = vmatpush.bf16.msrb.mxu2 %v2764_v9  ;;  %v573_v19 = vpop.f32.mrf.mxu2 }
  0xce   :  { %v574_v41 = vadd.f32 %v573_v19, %v120_v30  ;;  %v619_v46 = vpack.c.bf16 %v603_v37, %v603_v37  ;;  %v1857_v37 = vperm.slane %v878_v60, 1 }
  0xcf   :  { %1845 = vmatpush.bf16.msrb.mxu3 %v2772_v10  ;;  %1808 = vmatpush.bf16.msrb.mxu0 %v2746_v11  ;;  %v586_v20 = vpop.f32.mrf.mxu3  ;;  %v549_v23 = vpop.f32.mrf.mxu0 }
  0xd0   :  { %v587_v42 = vadd.f32 %v586_v20, %v121_v31  ;;  %v604_v47 = vmax.f32 %v574_v41, 0.0 }
  0xd1   :  { %1821 = vmatpush.bf16.msrb.mxu1 %v2754_v13  ;;  %1833 = vmatpush.bf16.msrb.mxu2 %v2763_v14  ;;  %v562_v28 = vpop.f32.mrf.mxu1 }
  0xd2   :  { %v605_v38 = vmax.f32 %v587_v42, 0.0  ;;  %v620_v50 = vpack.c.bf16 %v604_v47, %v604_v47 }
  0xd3   :  { %1846 = vmatpush.bf16.msrb.mxu3 %v2771_v15  ;;  %1809 = vmatpush.bf16.msrb.mxu0 %v2745_v16 }
  0xd4   :  { %v621_v51 = vpack.c.bf16 %v605_v38, %v605_v38 }
  0xd5   :  { %1822 = vmatpush.bf16.msrb.mxu1 %v2753_v22  ;;  %1834 = vmatpush.bf16.msrb.mxu2 %v2762_v24  ;;  %v575_v39 = vpop.f32.mrf.mxu2 }
  0xd7   :  { %1847 = vmatpush.bf16.msrb.mxu3 %v2770_v25  ;;  %1810 = vmatpush.bf16.msrb.mxu0 %v2744_v27  ;;  %v588_v40 = vpop.f32.mrf.mxu3 }
  0xd9   :  { %1823 = vmatpush.bf16.msrb.mxu1 %v2752_v32  ;;  %1835 = vmatpush.bf16.msrb.mxu2 %v2761_v33 }
  0xdb   :  { %1848 = vmatpush.bf16.msrb.mxu3 %v2769_v34  ;;  %1811 = vmatpush.bf16.msrb.mxu0 %v2743_v36 }
  0xdd   :  { %1824 = vmatpush.bf16.msrb.mxu1 %v2751_v43  ;;  %1836 = vmatpush.bf16.msrb.mxu2 %v2760_v44  ;;  %v2839_v43 = vmov 0   ;;  %v1861_v44 = vperm.slane %v878_v60, 2 }
  0xde   :  { %1812 = vmatmul.bf16.vlgmr.msrb.gmra.mxu0 %v618_v18  ;;  %2781 = vset.pattern.permute.xlu0 %v2839_v43 }
  0xdf   :  { %1849 = vmatpush.bf16.msrb.mxu3 %v2768_v45 }
  0xe0   :  { %1825 = vmatmul.bf16.vlgmr.msrb.gmra.mxu1 %v619_v46  ;;  %v1867_v46 = vlaneseq }
  0xe1   :  { %1837 = vmatpush.bf16.msrb.mxu2 %v2759_v48 }
  0xe2   :  { %v1868_v47 = vand.u32 127, %v1867_v46 }
  0xe3   :  { %1850 = vmatpush.bf16.msrb.mxu3 %v2767_v49 }
  0xe4   :  { %1838 = vmatmul.bf16.vlgmr.msrb.gmra.mxu2 %v620_v50 }
  0xe6   :  { %1851 = vmatmul.bf16.vlgmr.msrb.gmra.mxu3 %v621_v51 }
 0x11b   :  { %v1657_v52 = vpop.f32.mrf.mxu0 }
 0x11c   :  { %v1658_v2 = vadd.f32 %v1657_v52, %v879_v63 }
 0x11d   :  { %v1670_v53 = vpop.f32.mrf.mxu1 }
 0x11e   :  { %v1671_v5 = vadd.f32 %v1670_v53, %v1658_v2 }
 0x123   :  { %v1659_v54 = vpop.f32.mrf.mxu0 }
 0x125   :  { %v1672_v55 = vpop.f32.mrf.mxu1 }
 0x127   :  { %v1683_v56 = vpop.f32.mrf.mxu2 }
 0x128   :  { %v1684_v8 = vadd.f32 %v1683_v56, %v1671_v5 }
 0x129   :  { %v1696_v57 = vpop.f32.mrf.mxu3 }
 0x12a   :  { %v1697_v11 = vadd.f32 %v1696_v57, %v1684_v8 }
 0x12b   :  { %v1709_v58 = vpop.f32.mrf.mxu0 }
 0x12c   :  { %v1710_v14 = vadd.f32 %v1709_v58, %v1697_v11 }
 0x12d   :  { %v1722_v59 = vpop.f32.mrf.mxu1 }
 0x12e   :  { %v1723_v17 = vadd.f32 %v1722_v59, %v1710_v14 }
 0x12f   :  { %v1685_v61 = vpop.f32.mrf.mxu2 }
 0x131   :  { %v1698_v62 = vpop.f32.mrf.mxu3 }
 0x133   :  { %v1711_v0 = vpop.f32.mrf.mxu0 }
 0x135   :  { %v1724_v1 = vpop.f32.mrf.mxu1 }
 0x137   :  { %v1735_v3 = vpop.f32.mrf.mxu2 }
 0x138   :  { %v1736_v19 = vadd.f32 %v1735_v3, %v1723_v17 }
 0x139   :  { %v1748_v4 = vpop.f32.mrf.mxu3 }
 0x13a   :  { %v1749_v21 = vadd.f32 %v1748_v4, %v1736_v19 }
 0x13b   :  { %v1761_v6 = vpop.f32.mrf.mxu0 }
 0x13c   :  { %v1762_v23 = vadd.f32 %v1761_v6, %v1749_v21 }
 0x13d   :  { %v1774_v7 = vpop.f32.mrf.mxu1 }
 0x13e   :  { %v1775_v24 = vadd.f32 %v1774_v7, %v1762_v23 }
 0x13f   :  { %v1737_v9 = vpop.f32.mrf.mxu2 }
 0x141   :  { %v1750_v10 = vpop.f32.mrf.mxu3 }
 0x143   :  { %v1763_v12 = vpop.f32.mrf.mxu0 }
 0x145   :  { %v1776_v13 = vpop.f32.mrf.mxu1 }
 0x147   :  { %v1787_v15 = vpop.f32.mrf.mxu2 }
 0x148   :  { %v1788_v26 = vadd.f32 %v1787_v15, %v1775_v24 }
 0x149   :  { %v1800_v16 = vpop.f32.mrf.mxu3 }
 0x14a   :  { %v1801_v28 = vadd.f32 %v1800_v16, %v1788_v26 }
 0x14f   :  { %v1789_v20 = vpop.f32.mrf.mxu2 }
 0x151   :  { %v1802_v22 = vpop.f32.mrf.mxu3 }
 0x15b   :  { %v1813_v25 = vpop.f32.mrf.mxu0 }
 0x15c   :  { %v1814_v29 = vadd.f32 %v1813_v25, %v1801_v28 }
 0x15d   :  { %v1826_v27 = vpop.f32.mrf.mxu1 }
 0x15e   :  { %v1827_v32 = vadd.f32 %v1826_v27, %v1814_v29 }
 0x163   :  { %v1815_v30 = vpop.f32.mrf.mxu0 }
 0x165   :  { %v1828_v31 = vpop.f32.mrf.mxu1 }
 0x167   :  { %v1839_v33 = vpop.f32.mrf.mxu2 }
 0x168   :  { %v1840_v35 = vadd.f32 %v1839_v33, %v1827_v32 }
 0x169   :  { %v1852_v34 = vpop.f32.mrf.mxu3 }
 0x16a   :  { %v1853_v36 = vadd.f32 %v1852_v34, %v1840_v35 }
 0x16c   :  { %v1856_v39 = vmax.f32 %v1853_v36, 0.0 }
 0x16e   :  { %v1858_v40 = vmul.f32 %v1857_v37, %v1856_v39 }
 0x16f   :  { %v1841_v41 = vpop.f32.mrf.mxu2 }
 0x170   :  { %1859 = vadd.xlane.f32.xlu0 %v1858_v40 }
 0x171   :  { %v1854_v42 = vpop.f32.mrf.mxu3 }
 0x1e3   :  { %v1860_v45 = vpop.xlane.xlu0 %1859 }
 0x1e4   :  { %v1862_v18 = vadd.f32 %v1861_v44, %v1860_v45 }
 0x1e6   :  { %1865 = vperm.xlu0 %2781, %v1862_v18  }
 0x258   :  { %v1866_v38 = vpop.permute.xlu0 %1865 }
 0x259   :  { %v1869_v48 = vperm.slane %v1866_v38, %v1868_v47 }
 0x25b   :  { %1872 = vst.msk [vmem:[%s2950_s5] sm:$0x1] %vm1871_vm1, %v1869_v48 }
 0x25c   :  { %1877 = vsyncpa [#allocation3], 1 }
 0x25d   :  { %1878 = vsyncpa [#allocation5], 1 }

</bundles_post_ra>
